<compile_context>
chip_gen: v7x
topology: tpu7x:2x2x1
jax: 0.10.0
libtpu: 0.0.40
codegen_flags: <defaults>
</compile_context>

<pallas_src>
import jax
import jax.numpy as jnp
from jax.experimental import pallas as pl
from jax.experimental.pallas import tpu as pltpu


def pendulum_kernel(params_ref, x_ref, y_ref):
    # params_ref: SMEM (5,) f32 = [-omega^2, w00, 1 + w01, w10, w11]
    # x_ref, y_ref: VMEM (2, rt, 128) f32 — features on axis 0, batch packed
    # densely onto (sublane, lane) = (rt, 128).
    neg_omega_sq = params_ref[0]
    w00 = params_ref[1]
    one_plus_w01 = params_ref[2]
    w10 = params_ref[3]
    w11 = params_ref[4]

    pos = x_ref[0]                                   # (rt, 128) dense slab
    vel = x_ref[1]                                   # (rt, 128)

    # Row 0: dpos + (x @ W.T)[:, 0] = vel + w00*pos + w01*vel = w00*pos + (1+w01)*vel
    # Row 1: dvel + (x @ W.T)[:, 1] = -w^2*sin(pos) + w10*pos + w11*vel
    y_ref[0] = w00 * pos + one_plus_w01 * vel
    y_ref[1] = neg_omega_sq * jnp.sin(pos) + w10 * pos + w11 * vel


_LANES = 128
# (2, 2048, 128) f32 block = 2 MiB; in+out double-buffered ~8 MiB VMEM —
# fits default scoped VMEM on v5e (16 MiB), v6e (32 MiB) and v7x (32 MiB).
_DEFAULT_ROWS = 2048


def pendulum_forward(t, x, omega, w, rows_per_block=_DEFAULT_ROWS):
    """t is unused (as in the PyTorch module). x: (B, 2) f32 -> (B, 2) f32."""
    del t
    B = x.shape[0]
    x = jnp.asarray(x, jnp.float32)

    # Lane-rows of 128 batch elements; pad the lane axis only (cheap, <=127 cols).
    R = pl.cdiv(B, _LANES)
    b_pad = R * _LANES

    xt = jnp.transpose(x)                            # (2, B)  features-major
    if b_pad != B:
        xt = jnp.pad(xt, ((0, 0), (0, b_pad - B)))
    xt = jnp.reshape(xt, (2, R, _LANES))             # (2, R, 128) dense layout

    # rt multiple of 8 (or == R for small batches); ragged last block is safe:
    # the kernel is purely elementwise and padded rows/lanes are sliced off.
    rt = R if R <= rows_per_block else rows_per_block
    grid = pl.cdiv(R, rt)

    omega = jnp.asarray(omega, jnp.float32)
    w = jnp.asarray(w, jnp.float32)
    params = jnp.stack([
        -(omega * omega),                            # -omega^2 precomputed
        w[0, 0],
        1.0 + w[0, 1],                               # fold vel + w01*vel
        w[1, 0],
        w[1, 1],
    ]).astype(jnp.float32)

    out = pl.pallas_call(
        pendulum_kernel,
        out_shape=jax.ShapeDtypeStruct((2, R, _LANES), jnp.float32),
        grid=(grid,),
        in_specs=[
            pl.BlockSpec(memory_space=pltpu.MemorySpace.SMEM),   # params
            pl.BlockSpec((2, rt, _LANES), lambda i: (0, i, 0)),  # x tiles
        ],
        out_specs=pl.BlockSpec((2, rt, _LANES), lambda i: (0, i, 0)),
        compiler_params=pltpu.CompilerParams(
            dimension_semantics=("parallel",)),
    )(params, xt)

    # TODO(synk): if the caller can produce/consume the (2, R, 128) layout
    # directly, both wrapper transposes (one HBM read+write each) disappear.
    return jnp.transpose(jnp.reshape(out, (2, b_pad))[:, :B])   # (B, 2)


if __name__ == "__main__":
    key = jax.random.PRNGKey(0)
    kx, kw = jax.random.split(key)

    B = 8
    x = jax.random.normal(kx, (B, 2), dtype=jnp.float32)
    t = jnp.float32(0.0)  # unused by the model

    # Deterministic parameter init (synthetic; matches __init__ shapes)
    omega = jnp.float32(0.55)                                    # nn.Parameter(0.55)
    w = jax.random.normal(kw, (2, 2), dtype=jnp.float32) * 0.5   # Linear(2,2,bias=False).weight

    y = pendulum_forward(t, x, omega, w)
    y = jax.block_until_ready(y)

    # Reference check against plain-JAX semantics of the PyTorch forward.
    pos, vel = x[:, 0], x[:, 1]
    dvel = -(omega ** 2) * jnp.sin(pos)
    y_ref = jnp.stack((vel, dvel), axis=1) + x @ w.T
    assert jnp.allclose(y, y_ref, atol=1e-5, rtol=1e-5), "mismatch vs reference"

    print("KERNEL_OK")
</pallas_src>

<mosaic_0001>
module attributes {stable_mosaic.version = 11 : i64} {
  func.func @pendulum_kernel(%arg0: i32, %arg1: memref<5xf32, #tpu.memory_space<smem>>, %arg2: memref<2x1x128xf32, #tpu.memory_space<vmem>>, %arg3: memref<2x1x128xf32, #tpu.memory_space<vmem>>) attributes {dimension_semantics = [#tpu.dimension_semantics<parallel>], iteration_bounds = array<i64: 1>, scalar_prefetch = 0 : i64, scratch_operands = 0 : i64, tpu.core_type = #tpu.core_type<tc>, window_params = [{transform_indices = @transform_0, window_bounds = array<i64: 5>}, {transform_indices = @transform_1, window_bounds = array<i64: 2, 1, 128>}, {transform_indices = @transform_2, window_bounds = array<i64: 2, 1, 128>}]} {
    %c0 = arith.constant 0 : index
    %0 = memref.load %arg1[%c0] : memref<5xf32, #tpu.memory_space<smem>>
    %c1 = arith.constant 1 : index
    %1 = memref.load %arg1[%c1] : memref<5xf32, #tpu.memory_space<smem>>
    %c2 = arith.constant 2 : index
    %2 = memref.load %arg1[%c2] : memref<5xf32, #tpu.memory_space<smem>>
    %c3 = arith.constant 3 : index
    %3 = memref.load %arg1[%c3] : memref<5xf32, #tpu.memory_space<smem>>
    %c4 = arith.constant 4 : index
    %4 = memref.load %arg1[%c4] : memref<5xf32, #tpu.memory_space<smem>>
    %c0_0 = arith.constant 0 : index
    %c0_1 = arith.constant 0 : index
    %c0_2 = arith.constant 0 : index
    %5 = vector.load %arg2[%c0_0, %c0_1, %c0_2] : memref<2x1x128xf32, #tpu.memory_space<vmem>>, vector<1x1x128xf32>
    %6 = vector.shape_cast %5 : vector<1x1x128xf32> to vector<1x128xf32>
    %c1_3 = arith.constant 1 : index
    %c0_4 = arith.constant 0 : index
    %c0_5 = arith.constant 0 : index
    %7 = vector.load %arg2[%c1_3, %c0_4, %c0_5] : memref<2x1x128xf32, #tpu.memory_space<vmem>>, vector<1x1x128xf32>
    %8 = vector.shape_cast %7 : vector<1x1x128xf32> to vector<1x128xf32>
    %9 = vector.broadcast %1 : f32 to vector<1x128xf32>
    %10 = arith.mulf %9, %6 : vector<1x128xf32>
    %11 = vector.broadcast %2 : f32 to vector<1x128xf32>
    %12 = arith.mulf %11, %8 : vector<1x128xf32>
    %13 = arith.addf %10, %12 : vector<1x128xf32>
    %c0_6 = arith.constant 0 : index
    %c0_7 = arith.constant 0 : index
    %c0_8 = arith.constant 0 : index
    %14 = vector.load %arg3[%c0_6, %c0_7, %c0_8] : memref<2x1x128xf32, #tpu.memory_space<vmem>>, vector<1x1x128xf32>
    %15 = vector.shape_cast %14 : vector<1x1x128xf32> to vector<1x128xf32>
    %16 = vector.shape_cast %13 : vector<1x128xf32> to vector<1x1x128xf32>
    tpu.vector_store %arg3[%c0_6, %c0_7, %c0_8], %16 {strides = array<i32>} : memref<2x1x128xf32, #tpu.memory_space<vmem>>, vector<1x1x128xf32>,
    %17 = math.sin %6 : vector<1x128xf32>
    %18 = vector.broadcast %0 : f32 to vector<1x128xf32>
    %19 = arith.mulf %18, %17 : vector<1x128xf32>
    %20 = vector.broadcast %3 : f32 to vector<1x128xf32>
    %21 = arith.mulf %20, %6 : vector<1x128xf32>
    %22 = arith.addf %19, %21 : vector<1x128xf32>
    %23 = vector.broadcast %4 : f32 to vector<1x128xf32>
    %24 = arith.mulf %23, %8 : vector<1x128xf32>
    %25 = arith.addf %22, %24 : vector<1x128xf32>
    %c1_9 = arith.constant 1 : index
    %c0_10 = arith.constant 0 : index
    %c0_11 = arith.constant 0 : index
    %26 = vector.load %arg3[%c1_9, %c0_10, %c0_11] : memref<2x1x128xf32, #tpu.memory_space<vmem>>, vector<1x1x128xf32>
    %27 = vector.shape_cast %26 : vector<1x1x128xf32> to vector<1x128xf32>
    %28 = vector.shape_cast %25 : vector<1x128xf32> to vector<1x1x128xf32>
    tpu.vector_store %arg3[%c1_9, %c0_10, %c0_11], %28 {strides = array<i32>} : memref<2x1x128xf32, #tpu.memory_space<vmem>>, vector<1x1x128xf32>,
    return
  }
  func.func @transform_0(%arg0: i32) -> i32 {
    %c0_i32 = arith.constant 0 : i32
    %c0_i32_0 = arith.constant 0 : i32
    return %c0_i32 : i32
  }
  func.func @transform_1(%arg0: i32) -> (i32, i32, i32) {
    %c0_i32 = arith.constant 0 : i32
    %c0_i32_0 = arith.constant 0 : i32
    %c0_i32_1 = arith.constant 0 : i32
    return %c0_i32, %arg0, %c0_i32_0 : i32, i32, i32
  }
  func.func @transform_2(%arg0: i32) -> (i32, i32, i32) {
    %c0_i32 = arith.constant 0 : i32
    %c0_i32_0 = arith.constant 0 : i32
    %c0_i32_1 = arith.constant 0 : i32
    return %c0_i32, %arg0, %c0_i32_0 : i32, i32, i32
  }
}

</mosaic_0001>

<bundles_post_ra>
// kernel: tpu_custom_call.1
= control target key start
LH: loop header
LB: loop body
LE: loop exit
PB: predicated region body
PF: predicated region fallthrough
CT: control target
= control target key end

     0   :  { %7 = vsyncpa [#allocation4], 0  ;;  %s313_s0 = inlined_call_operand.hbm [shape: f32[5], index: 0, kind: input, shape index: {}]   ;;  %s314_s1 = inlined_call_operand.vmem [shape: f32[2,1,128], index: 1, kind: input, shape index: {}]   ;;  %s315_s2 = inlined_call_operand.hbm [shape: f32[2,1,128], index: 2, kind: output, shape index: {}]  }
   0x1   :  { %8 = vsyncpa [#allocation3], 0  ;;  %s195_s11 = scalar_lea.hbm %s313_s0, 16 }
   0x2   :  { %p196_p0 = scmp.ne.s32.totalorder %s313_s0, %s195_s11  ;;  %p199_p1 = scmp.lt.u32.totalorder %s195_s11, %s313_s0 }
   0x4   :  { %p201_p2 = pnand %p199_p1, %p196_p0 }
   0x6   :  { %204 = shalt.err (!%p201_p2)
}
   0x7   :  { %s231_s16 = smov [#allocation2]  }
   0x8   :  { %16 = dma.hbm_to_smem %s313_s0, 16, %s231_s16, [#allocation4]  }
   0x9   :  { %227 = dma.done.wait [#allocation4], 16  }
   0xa   :  { %228 = vsyncadd [#allocation4], 4294967280 }
   0xb   :  { %22 = sfence }
   0xc   :  { %s168_s19 = sld [smem:[#allocation2 + $0x1]]  ;;  %s169_s20 = sld [smem:[#allocation2 + $0x2]]  ;;  %v271_v0 = vld [vmem:[%s314_s1] sm:$0x1]  ;;  %v277_v3 = vld [vmem:[%s314_s1 + $0x1] sm:$0x1] }
   0xd   :  { %v40_v1 = vand.u32 2139095040, %v271_v0  ;;  %v37_v4 = vand.u32 2147483647, %v271_v0  ;;  %v232_v18 = vmov 683565275   ;;  %vm39_vm7 = vcmp.lt.s32.totalorder %v271_v0, 0 }
   0xe   :  { %v233_v20 = vmov 2475754826   ;;  %v234_v22 = vmov 2131351028   ;;  %v235_v24 = vmov 2102212464   ;;  %vm129_vm12 = vweird.f32 %v271_v0 }
   0xf   :  { %v41_v2 = vshrl.u32 %v40_v1, 23  ;;  %v44_v11 = vand.u32 8388607, %v37_v4  ;;  %v236_v26 = vmov 920167782   ;;  %s170_s0 = sld [smem:[#allocation2 + $0x3]] }
  0x10   :  { %v237_v33 = vmov 1326507024   ;;  %vm38_vm8 = vcmp.le.f32.partialorder %v37_v4, 0.7853982  ;;  %s23_s1 = sld [smem:[#allocation2]]  ;;  %s171_s25 = sld [smem:[#allocation2 + $0x4]] }
  0x11   :  { %v173_v5 = vadd.s32 4294967169, %v41_v2  ;;  %v45_v16 = vor.u32 8388608, %v44_v11  ;;  %s238_s26 = smov [#allocation5]  }
  0x12   :  { %v31_v6 = vstv %s168_s19  ;;  %v33_v7 = vstv %s169_s20  ;;  %s156_s27 = sshll.u32 %s238_s26, 4  ;;  %s157_s27 = int_to_ptr.vmem [resolvable:$true] %s156_s27 }
  0x13   :  { %v32_v8 = vmul.f32 %v31_v6, %v271_v0  ;;  %v34_v9 = vmul.f32 %v277_v3, %v33_v7  ;;  %v47_v10 = vadd.s32 1, %v173_v5  ;;  %v85_v35 = vshll.u32 %v45_v16, 8  ;;  %s205_s28 = scalar_lea.vmem %s157_s27, 32  ;;  %p210_p4 = scmp.lt.s32.totalorder %s157_s27, %s157_s27 }
  0x14   :  { %p206_p3 = scmp.ne.s32.totalorder %s157_s27, %s205_s28  ;;  %p211_p5 = scmp.lt.s32.totalorder %s205_s28, %s205_s28 }
  0x15   :  { %v35_v12 = vadd.f32 %v34_v9, %v32_v8  ;;  %vm48_vm0 = vcmp.gt.s32.totalorder %v47_v10, 0 }
  0x16   :  { %v49_v13 = vsel %vm48_vm0, %v47_v10, 0  ;;  %p212_p6 = por %p211_p5, %p210_p4 }
  0x17   :  { %36 = vst [vmem:[#allocation5] sm:$0x1] %v35_v12  ;;  %v51_v14 = vand.u32 31, %v49_v13  ;;  %v50_v15 = vshrl.u32 %v49_v13, 5 }
  0x18   :  { %p213_p7 = pnand %p212_p6, %p206_p3 }
  0x19   :  { %v52_v17 = vsub.s32 32, %v51_v14  ;;  %v54_v19 = vshll.u32 %v232_v18, %v51_v14  ;;  %v57_v21 = vshll.u32 %v233_v20, %v51_v14  ;;  %v60_v23 = vshll.u32 %v234_v22, %v51_v14 }
  0x1a   :  { %v63_v25 = vshll.u32 %v235_v24, %v51_v14  ;;  %v66_v27 = vshll.u32 %v236_v26, %v51_v14  ;;  %vm69_vm1 = vcmp.lt.s32.totalorder %v50_v15, 1  ;;  %vm72_vm2 = vcmp.lt.s32.totalorder %v50_v15, 4 }
  0x1b   :  { %v53_v28 = vshrl.u32 %v232_v18, %v52_v17  ;;  %v55_v29 = vshrl.u32 %v233_v20, %v52_v17  ;;  %v58_v30 = vshrl.u32 %v234_v22, %v52_v17  ;;  %v61_v31 = vshrl.u32 %v235_v24, %v52_v17 }
  0x1c   :  { %v64_v32 = vshrl.u32 %v236_v26, %v52_v17  ;;  %v67_v34 = vshrl.u32 %v237_v33, %v52_v17  ;;  %vm70_vm3 = vcmp.lt.s32.totalorder %v50_v15, 2  ;;  %vm71_vm4 = vcmp.lt.s32.totalorder %v50_v15, 3 }
  0x1d   :  { %v56_v36 = vor.u32 %v55_v29, %v54_v19  ;;  %v59_v37 = vor.u32 %v58_v30, %v57_v21  ;;  %v62_v38 = vor.u32 %v61_v31, %v60_v23 }
  0x1e   :  { %v65_v39 = vor.u32 %v64_v32, %v63_v25  ;;  %v68_v40 = vor.u32 %v67_v34, %v66_v27  ;;  %v143_v32 = vstv %s170_s0 }
  0x1f   :  { %v73_v41 = vsel %vm69_vm1, %v53_v28, %v56_v36  ;;  %v74_v42 = vsel %vm72_vm2, %v62_v38, 2102212464  ;;  %v77_v43 = vsel %vm69_vm1, %v56_v36, %v59_v37  ;;  %v81_v44 = vsel %vm69_vm1, %v59_v37, %v62_v38 }
  0x20   :  { %v75_v45 = vsel %vm71_vm4, %v59_v37, %v74_v42  ;;  %v78_v46 = vsel %vm72_vm2, %v65_v39, 920167782  ;;  %v82_v47 = vsel %vm72_vm2, %v68_v40, 1326507024  ;;  %v146_v36 = vstv %s171_s25 }
  0x21   :  { %v79_v48 = vsel %vm71_vm4, %v62_v38, %v78_v46  ;;  %v83_v49 = vsel %vm71_vm4, %v65_v39, %v82_v47  ;;  %v76_v50 = vsel %vm70_vm3, %v73_v41, %v75_v45  ;;  %v144_v38 = vmul.f32 %v143_v32, %v271_v0 }
  0x22   :  { %v80_v51 = vsel %vm70_vm3, %v77_v43, %v79_v48  ;;  %v84_v52 = vsel %vm70_vm3, %v81_v44, %v83_v49  ;;  %v92_v57 = vmul.u32 %v85_v35, %v76_v50  ;;  %v147_v41 = vmul.f32 %v277_v3, %v146_v36 }
  0x23   :  { %v284_v53 = vmul.u32.u64.low %v85_v35, %v84_v52  ;;  %v285_v54 = vmul.u32.u64.high %v85_v35, %v84_v52, %v284_v53  ;;  %v287_v55 = vmul.u32.u64.low %v85_v35, %v80_v51  ;;  %v288_v56 = vmul.u32.u64.high %v85_v35, %v80_v51, %v287_v55 }
  0x24   :  { %v141_v35 = vstv %s23_s1 }
  0x25   :  { %vm94_vm5 = vc.u32 %v285_v54, %v287_v55  ;;  %v95_v58 = vadd.s32 1, %v288_v56  ;;  %v93_v8 = vadd.s32 %v287_v55, %v285_v54 }
  0x27   :  { %v96_v59 = vsel %vm94_vm5, %v95_v58, %v288_v56 }
  0x28   :  { %v97_v60 = vadd.s32 %v96_v59, %v92_v57 }
  0x2a   :  { %v98_v61 = vadd.s32 536870912, %v97_v60 }
  0x2c   :  { %v99_v62 = vshrl.u32 %v98_v61, 30 }
  0x2e   :  { %v100_v63 = vshll.u32 %v99_v62, 30  ;;  %v123_v20 = vsub.s32 4, %v99_v62 }
  0x30   :  { %v101_v1 = vsub.s32 %v97_v60, %v100_v63  ;;  %v124_v23 = vsel %vm39_vm7, %v123_v20, %v99_v62 }
  0x31   :  { %v126_v26 = vsel %vm38_vm8, 0, %v124_v23 }
  0x32   :  { %v103_v2 = vsub.s32 0, %v101_v1  ;;  %v130_v27 = vadd.s32 3, %v126_v26 }
  0x34   :  { %v174_v5 = vmin.u32 %v103_v2, %v101_v1  ;;  %v131_v28 = vand.u32 3, %v130_v27 }
  0x36   :  { %v105_v6 = vclz %v174_v5  ;;  %vm136_vm9 = vcmp.eq.s32.totalorder %v131_v28, 2  ;;  %vm133_vm10 = vcmp.eq.s32.totalorder %v131_v28, 0  ;;  %vm132_vm11 = vcmp.lt.s32.totalorder %v131_v28, 2 }
  0x38   :  { %v175_v7 = vadd.s32 4294967294, %v105_v6 }
  0x3a   :  { %vm176_vm6 = vcmp.lt.s32.totalorder %v175_v7, 0 }
  0x3b   :  { %v108_v9 = vsel %vm176_vm6, 0, %v175_v7 }
  0x3c   :  { %v109_v10 = vsub.s32 32, %v108_v9  ;;  %v110_v11 = vshll.u32 %v101_v1, %v108_v9  ;;  %v113_v12 = vsub.s32 4294967266, %v108_v9 }
  0x3e   :  { %v111_v13 = vshrl.u32 %v93_v8, %v109_v10  ;;  %v114_v14 = vadd.s32 127, %v113_v12 }
  0x40   :  { %v112_v15 = vor.u32 %v111_v13, %v110_v11  ;;  %v115_v16 = vshll.u32 %v114_v14, 23 }
  0x42   :  { %v116_v17 = vor.u32 4788187, %v115_v16  ;;  %v119_v18 = vcvt.s32.f32 %v112_v15 }
  0x44   :  { %v117_v19 = vand.u32 2147483647, %v116_v17 }
  0x46   :  { %v120_v21 = vmul.f32 %v119_v18, %v117_v19 }
  0x48   :  { %v121_v22 = vxor.u32 2147483648, %v120_v21 }
  0x4a   :  { %v122_v24 = vsel %vm39_vm7, %v121_v22, %v120_v21 }
  0x4b   :  { %v125_v25 = vsel %vm38_vm8, %v271_v0, %v122_v24 }
  0x4c   :  { %191 = vcosq.f32 %v125_v25 }
  0x4d   :  { %193 = vsinq.f32 %v125_v25 }
  0x56   :  { %v192_v29 = vpop.eup %191 }
  0x57   :  { %v194_v30 = vpop.eup %193  ;;  %v137_v31 = vxor.u32 2147483648, %v192_v29 }
  0x58   :  { %v134_v4 = vxor.u32 2147483648, %v194_v30 }
  0x59   :  { %v138_v33 = vsel %vm136_vm9, %v137_v31, %v194_v30 }
  0x5a   :  { %v135_v34 = vsel %vm133_vm10, %v192_v29, %v134_v4 }
  0x5b   :  { %v139_v37 = vsel %vm132_vm11, %v135_v34, %v138_v33 }
  0x5c   :  { %v140_v39 = vsel %vm129_vm12, nan, %v139_v37 }
  0x5d   :  { %v142_v40 = vmul.f32 %v141_v35, %v140_v39 }
  0x5f   :  { %v145_v42 = vadd.f32 %v144_v38, %v142_v40 }
  0x61   :  { %v148_v43 = vadd.f32 %v147_v41, %v145_v42 }
  0x63   :  { %150 = vst [vmem:[#allocation5 + $0x1] sm:$0x1] %v148_v43 }
  0x64   :  { %216 = shalt.err (!%p213_p7)
}
  0x65   :  { %s217_s3 = scalar_lea.hbm %s315_s2, 32 }
  0x66   :  { %p218_p8 = scmp.ne.s32.totalorder %s315_s2, %s217_s3  ;;  %p221_p9 = scmp.lt.u32.totalorder %s217_s3, %s315_s2 }
  0x68   :  { %p223_p10 = pnand %p221_p9, %p218_p8 }
  0x6a   :  { %226 = shalt.err (!%p223_p10)
}
  0x6b   :  { %s239_s8 = smov 16   ;;  %s240_s9 = smov 1  }
  0x6c   :  { %162 = dma.vmem_to_hbm [thread:$0]  %s157_s27, 32, %s315_s2, [#allocation3], %s239_s8, %s239_s8, %s240_s9  }
  0x6d   :  { %229 = dma.done.wait [#allocation3], 32  }
  0x6e   :  { %230 = vsyncadd [#allocation3], 4294967264 }
  0x6f   :  { %166 = vsyncpa [#allocation3], 1 }
  0x70   :  { %167 = vsyncpa [#allocation4], 1 }

</bundles_post_ra>
